<compile_context>
chip_gen: v7x
topology: tpu7x:2x2x1
jax: 0.10.0
libtpu: 0.0.40
codegen_flags: <defaults>
</compile_context>

<pallas_src>
from functools import partial

import jax
import jax.numpy as jnp
from jax.experimental import pallas as pl
from jax.experimental.pallas import tpu as pltpu

INPUT_DIM = 4
HIDDEN_DIM = 64
OUTPUT_DIM = 1

LANE = 128        # TPU lane width: batch tile must be a multiple of this
TILE_B = 1024     # default batch tile (lanes); tiny VMEM footprint, good pipelining


def _round_up(n, m):
    return ((n + m - 1) // m) * m


def _mlp_kernel(x_ref, w1_ref, b1_ref, w2_ref, b2_ref, w3_ref, b3_ref, o_ref):
    # x_ref: (IN, TB) bf16 | weights: torch-style (out, in) bf16 | biases: (out, 1) f32
    x = x_ref[...]

    # fc1: (64,4)@(4,TB). K=4 underutilizes the MXU but the op is tiny; fc2
    # (64x64) is the only matmul with real MXU work.
    # TODO(synk): optionally lower fc1 to 4 unrolled VPU broadcast-FMAs if the
    # vmatmul push slot ever shows as the bottleneck in a bundle dump.
    h1 = jnp.dot(w1_ref[...], x, preferred_element_type=jnp.float32) + b1_ref[...]
    h1 = jnp.maximum(h1, 0.0).astype(jnp.bfloat16)          # relu in f32, recast for MXU

    h2 = jnp.dot(w2_ref[...], h1, preferred_element_type=jnp.float32) + b2_ref[...]
    h2 = jnp.maximum(h2, 0.0).astype(jnp.bfloat16)

    out = jnp.dot(w3_ref[...], h2, preferred_element_type=jnp.float32) + b3_ref[...]
    o_ref[...] = out.astype(o_ref.dtype)                    # (1, TB): lane-dense store


def prepare_params(params):
    """One-time conversion of torch-style params to the kernel-ready layout.

    In the feature-major kernel (y = W @ x + b) the torch (out, in) weight
    orientation is already correct, so this is just dtype casts + bias reshape.
    Call once at parameter-load time, not per forward call.
    """
    return {
        "w1": params["w1"].astype(jnp.bfloat16),
        "w2": params["w2"].astype(jnp.bfloat16),
        "w3": params["w3"].astype(jnp.bfloat16),
        "b1": params["b1"].reshape(HIDDEN_DIM, 1).astype(jnp.float32),
        "b2": params["b2"].reshape(HIDDEN_DIM, 1).astype(jnp.float32),
        "b3": params["b3"].reshape(OUTPUT_DIM, 1).astype(jnp.float32),
    }


@partial(jax.jit, static_argnames=("tile_b",))
def _forward_2d(x, kparams, *, tile_b=TILE_B):
    """x: (B, INPUT_DIM) float32 -> (B, OUTPUT_DIM) float32."""
    b = x.shape[0]
    # Lane-aligned batch tile; pad the batch so every grid step is a full tile.
    tb = min(_round_up(tile_b, LANE), _round_up(b, LANE))
    b_pad = _round_up(b, tb)

    # Feature-major, lane-dense input: (IN, B_pad) bf16 (batch on the lane axis).
    x_fm = jnp.pad(x, ((0, b_pad - b), (0, 0))).T.astype(jnp.bfloat16)

    grid = (b_pad // tb,)
    const = lambda i: (0, 0)   # resident weights / biases: same block every step

    out_fm = pl.pallas_call(
        _mlp_kernel,
        out_shape=jax.ShapeDtypeStruct((OUTPUT_DIM, b_pad), jnp.float32),
        grid=grid,
        in_specs=[
            pl.BlockSpec((INPUT_DIM, tb), lambda i: (0, i)),   # x: streamed over batch
            pl.BlockSpec((HIDDEN_DIM, INPUT_DIM), const),      # w1 (64, 4)
            pl.BlockSpec((HIDDEN_DIM, 1), const),              # b1 (64, 1)
            pl.BlockSpec((HIDDEN_DIM, HIDDEN_DIM), const),     # w2 (64, 64)
            pl.BlockSpec((HIDDEN_DIM, 1), const),              # b2 (64, 1)
            pl.BlockSpec((OUTPUT_DIM, HIDDEN_DIM), const),     # w3 (1, 64)
            pl.BlockSpec((OUTPUT_DIM, 1), const),              # b3 (1, 1)
        ],
        out_specs=pl.BlockSpec((OUTPUT_DIM, tb), lambda i: (0, i)),
        compiler_params=pltpu.CompilerParams(
            dimension_semantics=("parallel",)),  # v7x: shard batch across both TCs
    )(x_fm, kparams["w1"], kparams["b1"], kparams["w2"], kparams["b2"],
      kparams["w3"], kparams["b3"])

    # Drop the pad columns and return torch layout (B, OUTPUT_DIM).
    return out_fm[:, :b].T


def state_value_network_forward(x, kparams, *, tile_b=TILE_B):
    """Matches torch semantics: arbitrary leading dims, last dim = INPUT_DIM."""
    lead = x.shape[:-1]
    x2d = x.reshape(-1, INPUT_DIM) if x.ndim != 2 else x
    out = _forward_2d(x2d, kparams, tile_b=tile_b)
    return out.reshape(*lead, OUTPUT_DIM) if x.ndim != 2 else out


def init_params(key, input_dim=INPUT_DIM, hidden=HIDDEN_DIM, output=OUTPUT_DIM):
    """Deterministic init mimicking PyTorch nn.Linear default (U[-1/sqrt(fan_in), +])."""
    ks = jax.random.split(key, 6)

    def lin(kw, kb, fan_in, fan_out):
        bound = 1.0 / jnp.sqrt(fan_in)
        w = jax.random.uniform(kw, (fan_out, fan_in), jnp.float32, -bound, bound)
        b = jax.random.uniform(kb, (fan_out,), jnp.float32, -bound, bound)
        return w, b

    w1, b1 = lin(ks[0], ks[1], input_dim, hidden)
    w2, b2 = lin(ks[2], ks[3], hidden, hidden)
    w3, b3 = lin(ks[4], ks[5], hidden, output)
    return {"w1": w1, "b1": b1, "w2": w2, "b2": b2, "w3": w3, "b3": b3}


def _reference(x, p):
    h1 = jnp.maximum(x @ p["w1"].T + p["b1"], 0.0)
    h2 = jnp.maximum(h1 @ p["w2"].T + p["b2"], 0.0)
    return h2 @ p["w3"].T + p["b3"]


if __name__ == "__main__":
    key = jax.random.PRNGKey(0)
    k_param, k_x1, k_x2 = jax.random.split(key, 3)

    params = init_params(k_param)
    kparams = prepare_params(params)  # one-time, kernel-ready layout

    # Small batch (pads up to one 128-lane tile, grid=(1,)).
    batch = 8
    x = jax.random.normal(k_x1, (batch, INPUT_DIM), dtype=jnp.float32)
    out = jax.block_until_ready(state_value_network_forward(x, kparams))
    ref = _reference(x, params)
    assert out.shape == (batch, OUTPUT_DIM), out.shape
    # bf16 weights/activations with f32 accumulation -> relaxed tolerance vs f32 ref.
    assert jnp.allclose(out, ref, atol=5e-2, rtol=5e-2), "mismatch vs reference (small batch)"

    # Ragged batch with a multi-step grid (tile_b=128 -> 3 grid steps) to exercise
    # tiling, padding, and the parallel batch axis.
    batch2 = 300
    x2 = jax.random.normal(k_x2, (batch2, INPUT_DIM), dtype=jnp.float32)
    out2 = jax.block_until_ready(state_value_network_forward(x2, kparams, tile_b=128))
    ref2 = _reference(x2, params)
    assert out2.shape == (batch2, OUTPUT_DIM), out2.shape
    assert jnp.allclose(out2, ref2, atol=5e-2, rtol=5e-2), "mismatch vs reference (tiled batch)"

    print("KERNEL_OK")
</pallas_src>

<mosaic_0001>
module attributes {stable_mosaic.version = 11 : i64} {
  func.func @_mlp_kernel(%arg0: i32, %arg1: memref<4x128xbf16, #tpu.memory_space<vmem>>, %arg2: memref<64x4xbf16, #tpu.memory_space<vmem>>, %arg3: memref<64x1xf32, #tpu.memory_space<vmem>>, %arg4: memref<64x64xbf16, #tpu.memory_space<vmem>>, %arg5: memref<64x1xf32, #tpu.memory_space<vmem>>, %arg6: memref<1x64xbf16, #tpu.memory_space<vmem>>, %arg7: memref<1x1xf32, #tpu.memory_space<vmem>>, %arg8: memref<1x128xf32, #tpu.memory_space<vmem>>) attributes {dimension_semantics = [#tpu.dimension_semantics<parallel>], iteration_bounds = array<i64: 1>, scalar_prefetch = 0 : i64, scratch_operands = 0 : i64, tpu.core_type = #tpu.core_type<tc>, window_params = [{transform_indices = @transform_0, window_bounds = array<i64: 4, 128>}, {pipeline_mode = #tpu.pipeline_mode<synchronous>, transform_indices = @transform_1, window_bounds = array<i64: 64, 4>}, {pipeline_mode = #tpu.pipeline_mode<synchronous>, transform_indices = @transform_2, window_bounds = array<i64: 64, 1>}, {pipeline_mode = #tpu.pipeline_mode<synchronous>, transform_indices = @transform_3, window_bounds = array<i64: 64, 64>}, {pipeline_mode = #tpu.pipeline_mode<synchronous>, transform_indices = @transform_4, window_bounds = array<i64: 64, 1>}, {pipeline_mode = #tpu.pipeline_mode<synchronous>, transform_indices = @transform_5, window_bounds = array<i64: 1, 64>}, {pipeline_mode = #tpu.pipeline_mode<synchronous>, transform_indices = @transform_6, window_bounds = array<i64: 1, 1>}, {transform_indices = @transform_7, window_bounds = array<i64: 1, 128>}]} {
    %c0 = arith.constant 0 : index
    %c0_0 = arith.constant 0 : index
    %0 = vector.load %arg1[%c0, %c0_0] : memref<4x128xbf16, #tpu.memory_space<vmem>>, vector<4x128xbf16>
    %c0_1 = arith.constant 0 : index
    %c0_2 = arith.constant 0 : index
    %1 = vector.load %arg2[%c0_1, %c0_2] : memref<64x4xbf16, #tpu.memory_space<vmem>>, vector<64x4xbf16>
    %cst = arith.constant dense<0.000000e+00> : vector<64x128xf32>
    %2 = tpu.matmul %1, %0, %cst {dimension_numbers = #tpu.dot_dimension_numbers<[1], [0], [0], [1], [0, 0, 1, 1], [], []>} : vector<64x4xbf16>, vector<4x128xbf16>, vector<64x128xf32> -> vector<64x128xf32>
    %c0_3 = arith.constant 0 : index
    %c0_4 = arith.constant 0 : index
    %3 = vector.load %arg3[%c0_3, %c0_4] : memref<64x1xf32, #tpu.memory_space<vmem>>, vector<64x1xf32>
    %4 = vector.broadcast %3 : vector<64x1xf32> to vector<64x128xf32>
    %5 = arith.addf %2, %4 : vector<64x128xf32>
    %cst_5 = arith.constant 0.000000e+00 : f32
    %6 = vector.broadcast %cst_5 : f32 to vector<64x128xf32>
    %7 = arith.maximumf %5, %6 : vector<64x128xf32>
    %8 = arith.truncf %7 : vector<64x128xf32> to vector<64x128xbf16>
    %c0_6 = arith.constant 0 : index
    %c0_7 = arith.constant 0 : index
    %9 = vector.load %arg4[%c0_6, %c0_7] : memref<64x64xbf16, #tpu.memory_space<vmem>>, vector<64x64xbf16>
    %cst_8 = arith.constant dense<0.000000e+00> : vector<64x128xf32>
    %10 = tpu.matmul %9, %8, %cst_8 {dimension_numbers = #tpu.dot_dimension_numbers<[1], [0], [0], [1], [0, 0, 1, 1], [], []>} : vector<64x64xbf16>, vector<64x128xbf16>, vector<64x128xf32> -> vector<64x128xf32>
    %c0_9 = arith.constant 0 : index
    %c0_10 = arith.constant 0 : index
    %11 = vector.load %arg5[%c0_9, %c0_10] : memref<64x1xf32, #tpu.memory_space<vmem>>, vector<64x1xf32>
    %12 = vector.broadcast %11 : vector<64x1xf32> to vector<64x128xf32>
    %13 = arith.addf %10, %12 : vector<64x128xf32>
    %cst_11 = arith.constant 0.000000e+00 : f32
    %14 = vector.broadcast %cst_11 : f32 to vector<64x128xf32>
    %15 = arith.maximumf %13, %14 : vector<64x128xf32>
    %16 = arith.truncf %15 : vector<64x128xf32> to vector<64x128xbf16>
    %c0_12 = arith.constant 0 : index
    %c0_13 = arith.constant 0 : index
    %17 = vector.load %arg6[%c0_12, %c0_13] : memref<1x64xbf16, #tpu.memory_space<vmem>>, vector<1x64xbf16>
    %cst_14 = arith.constant dense<0.000000e+00> : vector<1x128xf32>
    %18 = tpu.matmul %17, %16, %cst_14 {dimension_numbers = #tpu.dot_dimension_numbers<[1], [0], [0], [1], [0, 0, 1, 1], [], []>} : vector<1x64xbf16>, vector<64x128xbf16>, vector<1x128xf32> -> vector<1x128xf32>
    %c0_15 = arith.constant 0 : index
    %c0_16 = arith.constant 0 : index
    %19 = vector.load %arg7[%c0_15, %c0_16] : memref<1x1xf32, #tpu.memory_space<vmem>>, vector<1x1xf32>
    %20 = vector.broadcast %19 : vector<1x1xf32> to vector<1x128xf32>
    %21 = arith.addf %18, %20 : vector<1x128xf32>
    %c0_17 = arith.constant 0 : index
    %c0_18 = arith.constant 0 : index
    %22 = vector.load %arg8[%c0_17, %c0_18] : memref<1x128xf32, #tpu.memory_space<vmem>>, vector<1x128xf32>
    tpu.vector_store %arg8[%c0_17, %c0_18], %21 {strides = array<i32>} : memref<1x128xf32, #tpu.memory_space<vmem>>, vector<1x128xf32>,
    return
  }
  func.func @transform_0(%arg0: i32) -> (i32, i32) {
    %c0_i32 = arith.constant 0 : i32
    %c0_i32_0 = arith.constant 0 : i32
    return %c0_i32, %arg0 : i32, i32
  }
  func.func @transform_1(%arg0: i32) -> (i32, i32) {
    %c0_i32 = arith.constant 0 : i32
    %c0_i32_0 = arith.constant 0 : i32
    %c0_i32_1 = arith.constant 0 : i32
    return %c0_i32, %c0_i32_0 : i32, i32
  }
  func.func @transform_2(%arg0: i32) -> (i32, i32) {
    %c0_i32 = arith.constant 0 : i32
    %c0_i32_0 = arith.constant 0 : i32
    %c0_i32_1 = arith.constant 0 : i32
    return %c0_i32, %c0_i32_0 : i32, i32
  }
  func.func @transform_3(%arg0: i32) -> (i32, i32) {
    %c0_i32 = arith.constant 0 : i32
    %c0_i32_0 = arith.constant 0 : i32
    %c0_i32_1 = arith.constant 0 : i32
    return %c0_i32, %c0_i32_0 : i32, i32
  }
  func.func @transform_4(%arg0: i32) -> (i32, i32) {
    %c0_i32 = arith.constant 0 : i32
    %c0_i32_0 = arith.constant 0 : i32
    %c0_i32_1 = arith.constant 0 : i32
    return %c0_i32, %c0_i32_0 : i32, i32
  }
  func.func @transform_5(%arg0: i32) -> (i32, i32) {
    %c0_i32 = arith.constant 0 : i32
    %c0_i32_0 = arith.constant 0 : i32
    %c0_i32_1 = arith.constant 0 : i32
    return %c0_i32, %c0_i32_0 : i32, i32
  }
  func.func @transform_6(%arg0: i32) -> (i32, i32) {
    %c0_i32 = arith.constant 0 : i32
    %c0_i32_0 = arith.constant 0 : i32
    %c0_i32_1 = arith.constant 0 : i32
    return %c0_i32, %c0_i32_0 : i32, i32
  }
  func.func @transform_7(%arg0: i32) -> (i32, i32) {
    %c0_i32 = arith.constant 0 : i32
    %c0_i32_0 = arith.constant 0 : i32
    return %c0_i32, %arg0 : i32, i32
  }
}

</mosaic_0001>

<bundles_post_ra>
// kernel: _forward_2d.1
= control target key start
LH: loop header
LB: loop body
LE: loop exit
PB: predicated region body
PF: predicated region fallthrough
CT: control target
= control target key end

     0   :  { %vm119_vm0 = vcmask 1041408   ;;  %vm106_vm1 = vcmask 31744   ;;  %v512_v1 = vmov 0   ;;  %vm276_vm2 = vcmask 523264   ;;  %s648_s0 = inlined_call_operand.vmem [shape: bf16[4,128], index: 0, kind: input, shape index: {}]   ;;  %s649_s1 = inlined_call_operand.vmem [shape: bf16[64,4], index: 1, kind: input, shape index: {}]   ;;  %s650_s6 = inlined_call_operand.<no memory space> [shape: f32[1,1], index: 6, kind: input, shape index: {}]   ;;  %s651_s2 = inlined_call_operand.vmem [shape: f32[64,1], index: 2, kind: input, shape index: {}]   ;;  %s652_s4 = inlined_call_operand.vmem [shape: f32[64,1], index: 4, kind: input, shape index: {}]   ;;  %s653_s3 = inlined_call_operand.vmem [shape: bf16[64,64], index: 3, kind: input, shape index: {}]   ;;  %s654_s5 = inlined_call_operand.vmem [shape: bf16[1,64], index: 5, kind: input, shape index: {}]   ;;  %s655_s7 = inlined_call_operand.vmem [shape: f32[1,128], index: 7, kind: output, shape index: {}]  }
   0x1   :  { %v29_v0 = vld [vmem:[%s648_s0] sm:$0x3]  ;;  %502 = vset.pattern.permute.xlu0 %v512_v1  ;;  %503 = vset.pattern.permute.xlu1 %v512_v1  ;;  %v12_v2 = vstv %s650_s6  ;;  %v505_v5 = vld [vmem:[%s649_s1 + $0x8] sm:$0xff]   ;;  %v506_v6 = vld [vmem:[%s649_s1 + $0x10] sm:$0xff]   ;;  %v513_v1 = vmov 0.0   ;;  %vm514_vm3 = vmmov 0  }
   0x2   :  { %498 = vmatprep.subr.msk.bf16.mxu0 %vm119_vm0, %v29_v0  ;;  %v121_v3 = vsel %vm119_vm0, %v29_v0, 0  ;;  %v504_v4 = vld [vmem:[%s649_s1] sm:$0xff]   ;;  %13 = vst [vmem:[#allocation2] sm:$0x1] %v12_v2  ;;  %v40_v8 = vld [vmem:[%s651_s2 + $0x10] sm:$0xff]  ;;  %v39_v9 = vld [vmem:[%s651_s2 + $0x8] sm:$0xff] }
   0x3   :  { %461 = vmatpush3.bf16.msra.mxu0 %v121_v3  ;;  %462 = vmatprep.mubr.msk.bf16.mxu0 %vm106_vm1, %v504_v4  ;;  %v38_v7 = vld [vmem:[%s651_s2] sm:$0xff]  ;;  %v41_v10 = vld [vmem:[%s651_s2 + $0x18] sm:$0xff]  ;;  %v43_v13 = vld [vmem:[%s651_s2 + $0x28] sm:$0xff] }
   0x4   :  { %48 = vperm.xlu0 %502, %v38_v7   ;;  %58 = vperm.xlu1 %503, %v40_v8   ;;  %v507_v11 = vld [vmem:[%s649_s1 + $0x18] sm:$0xff]   ;;  %v42_v12 = vld [vmem:[%s651_s2 + $0x20] sm:$0xff]  ;;  %v44_v14 = vld [vmem:[%s651_s2 + $0x30] sm:$0xff] }
   0x5   :  { %v45_v15 = vld [vmem:[%s651_s2 + $0x38] sm:$0xff]  ;;  %v208_v16 = vld [vmem:[%s652_s4] sm:$0xff]  ;;  %v209_v17 = vld [vmem:[%s652_s4 + $0x8] sm:$0xff]  ;;  %486 = vmatprep.subr.bf16.mxu0 %v513_v1 }
   0x6   :  { %463 = vmatmul.mubr.msk.bf16.vlgmr.msra.gmra.mrb[0].mxu0 %vm106_vm1, %v505_v5  ;;  %v210_v18 = vld [vmem:[%s652_s4 + $0x10] sm:$0xff]  ;;  %v211_v19 = vld [vmem:[%s652_s4 + $0x18] sm:$0xff]  ;;  %v212_v20 = vld [vmem:[%s652_s4 + $0x20] sm:$0xff] }
   0x7   :  { %466 = vmatprep.mubr.msk.bf16.mxu0 %vm106_vm1, %v506_v6  ;;  %v213_v21 = vld [vmem:[%s652_s4 + $0x28] sm:$0xff]  ;;  %v214_v22 = vld [vmem:[%s652_s4 + $0x30] sm:$0xff]  ;;  %v215_v23 = vld [vmem:[%s652_s4 + $0x38] sm:$0xff] }
   0x8   :  { %53 = vperm.xlu0 %502, %v39_v9   ;;  %63 = vperm.xlu1 %503, %v41_v10   ;;  %v508_v25 = vld [vmem:[%s653_s3] sm:$0xff]   ;;  %v509_v62 = vld [vmem:[%s653_s3 + $0x8] sm:$0xff]   ;;  %v510_v63 = vld [vmem:[%s653_s3 + $0x10] sm:$0xff]  }
   0x9   :  { %v367_v24 = vld [vmem:[#allocation2] sm:$0x1]  ;;  %478 = vmatprep.mubr.msk.bf16.mxu1 %vm276_vm2, %v508_v25  ;;  %v511_v0 = vld [vmem:[%s653_s3 + $0x18] sm:$0xff]  }
   0xc   :  { %68 = vperm.xlu0 %502, %v42_v12   ;;  %73 = vperm.xlu1 %503, %v43_v13  }
   0xe   :  { %467 = vmatmul.mubr.msk.bf16.gmra.mrb[4].mxu0 %vm106_vm1, %v507_v11 }
   0xf   :  { %494 = vmatprep.mubr.msk.bf16.mxu0 %vm514_vm3, %v513_v1 }
  0x10   :  { %78 = vperm.xlu0 %502, %v44_v14   ;;  %83 = vperm.xlu1 %503, %v45_v15  }
  0x14   :  { %218 = vperm.xlu0 %502, %v208_v16   ;;  %223 = vperm.xlu1 %503, %v209_v17  }
  0x18   :  { %228 = vperm.xlu0 %502, %v210_v18   ;;  %233 = vperm.xlu1 %503, %v211_v19  }
  0x1c   :  { %238 = vperm.xlu0 %502, %v212_v20   ;;  %243 = vperm.xlu1 %503, %v213_v21  }
  0x20   :  { %248 = vperm.xlu0 %502, %v214_v22   ;;  %253 = vperm.xlu1 %503, %v215_v23  }
  0x24   :  { %370 = vperm.xlu0 %502, %v367_v24  }
  0x83   :  { %v49_v26 = vpop.permute.xlu0 %48  ;;  %v59_v27 = vpop.permute.xlu1 %58 }
  0x87   :  { %v54_v28 = vpop.permute.xlu0 %53  ;;  %v64_v29 = vpop.permute.xlu1 %63 }
  0x8b   :  { %v69_v33 = vpop.permute.xlu0 %68  ;;  %v74_v38 = vpop.permute.xlu1 %73 }
  0x8f   :  { %v79_v45 = vpop.permute.xlu0 %78  ;;  %v84_v50 = vpop.permute.xlu1 %83 }
  0x93   :  { %v219_v2 = vpop.permute.xlu0 %218  ;;  %v224_v3 = vpop.permute.xlu1 %223 }
  0x97   :  { %v229_v4 = vpop.permute.xlu0 %228  ;;  %v234_v5 = vpop.permute.xlu1 %233 }
  0x9b   :  { %v239_v9 = vpop.permute.xlu0 %238  ;;  %v244_v14 = vpop.permute.xlu1 %243 }
  0x9f   :  { %v249_v21 = vpop.permute.xlu0 %248 }
  0xd9   :  { %v464_v30 = vpop.f32.mrb[0].mxu0 }
  0xda   :  { %v166_v31 = vadd.f32 %v464_v30, %v59_v27  ;;  %v157_v32 = vpop.f32.mrb[1].mxu0 }
  0xdb   :  { %v158_v34 = vadd.f32 %v157_v32, %v49_v26  ;;  %v465_v35 = vpop.f32.mrb[2].mxu0  ;;  %v254_v26 = vpop.permute.xlu1 %253 }
  0xdc   :  { %v169_v36 = vadd.f32 %v465_v35, %v64_v29  ;;  %v160_v37 = vpop.f32.mrb[3].mxu0  ;;  %v190_v40 = vmax.f32 %v166_v31, 0.0 }
  0xdd   :  { %v161_v39 = vadd.f32 %v160_v37, %v54_v28  ;;  %v188_v42 = vmax.f32 %v158_v34, 0.0 }
  0xde   :  { %v191_v41 = vmax.f32 %v169_v36, 0.0 }
  0xdf   :  { %v189_v43 = vmax.f32 %v161_v39, 0.0  ;;  %v373_v39 = vlaneseq }
  0xe0   :  { %v197_v44 = vpack.c.bf16 %v191_v41, %v190_v40 }
  0xe1   :  { %v468_v46 = vpop.f32.mrb[4].mxu0  ;;  %v196_v47 = vpack.c.bf16 %v189_v43, %v188_v42  ;;  %v374_v40 = vshrl.u32 %v373_v39, 7  ;;  %v371_v42 = vpop.permute.xlu0 %370 }
  0xe2   :  { %v182_v48 = vadd.f32 %v468_v46, %v79_v45  ;;  %v173_v49 = vpop.f32.mrb[5].mxu0 }
  0xe3   :  { %v174_v51 = vadd.f32 %v173_v49, %v69_v33  ;;  %v469_v52 = vpop.f32.mrb[6].mxu0  ;;  %470 = vmatprep.subr.bf16.mxu1 %v196_v47  ;;  %v375_v41 = vsub.s32 0, %v374_v40 }
  0xe4   :  { %v185_v53 = vadd.f32 %v469_v52, %v84_v50  ;;  %v176_v54 = vpop.f32.mrb[7].mxu0  ;;  %471 = vmatpush3.bf16.msra.mxu1 %v196_v47  ;;  %v194_v56 = vmax.f32 %v182_v48, 0.0 }
  0xe5   :  { %v177_v55 = vadd.f32 %v176_v54, %v74_v38  ;;  %472 = vmatprep.subr.bf16.mxu1 %v197_v44  ;;  %v192_v58 = vmax.f32 %v174_v51, 0.0  ;;  %v366_v38 = vld [vmem:[%s654_s5] sm:$0x1]  ;;  %v376_v43 = vrot.slane %v371_v42, %v375_v41 }
  0xe6   :  { %v195_v57 = vmax.f32 %v185_v53, 0.0 }
  0xe7   :  { %v193_v59 = vmax.f32 %v177_v55, 0.0 }
  0xe8   :  { %v199_v60 = vpack.c.bf16 %v195_v57, %v194_v56  ;;  %473 = vmatpush3.bf16.msra.mxu1 %v197_v44 }
  0xe9   :  { %v198_v61 = vpack.c.bf16 %v193_v59, %v192_v58 }
  0xeb   :  { %474 = vmatprep.subr.bf16.mxu1 %v198_v61 }
  0xec   :  { %475 = vmatpush3.bf16.msra.mxu1 %v198_v61 }
  0xed   :  { %476 = vmatprep.subr.bf16.mxu1 %v199_v60 }
  0xf0   :  { %477 = vmatpush3.bf16.msra.mxu1 %v199_v60 }
  0xf3   :  { %479 = vmatmul.mubr.msk.bf16.vlgmr.msra.gmra.mrb[0].mxu1 %vm276_vm2, %v509_v62 }
  0xf4   :  { %482 = vmatprep.mubr.msk.bf16.mxu1 %vm276_vm2, %v510_v63 }
  0xfb   :  { %483 = vmatmul.mubr.msk.bf16.gmra.mrb[4].mxu1 %vm276_vm2, %v511_v0 }
 0x1c6   :  { %v480_v6 = vpop.f32.mrb[0].mxu1 }
 0x1c7   :  { %v332_v7 = vadd.f32 %v480_v6, %v229_v4  ;;  %v323_v8 = vpop.f32.mrb[1].mxu1 }
 0x1c8   :  { %v324_v10 = vadd.f32 %v323_v8, %v219_v2  ;;  %v481_v11 = vpop.f32.mrb[2].mxu1 }
 0x1c9   :  { %v335_v12 = vadd.f32 %v481_v11, %v234_v5  ;;  %v326_v13 = vpop.f32.mrb[3].mxu1  ;;  %v356_v16 = vmax.f32 %v332_v7, 0.0 }
 0x1ca   :  { %v327_v15 = vadd.f32 %v326_v13, %v224_v3  ;;  %v354_v18 = vmax.f32 %v324_v10, 0.0 }
 0x1cb   :  { %v357_v17 = vmax.f32 %v335_v12, 0.0 }
 0x1cc   :  { %v355_v19 = vmax.f32 %v327_v15, 0.0 }
 0x1cd   :  { %v363_v20 = vpack.c.bf16 %v357_v17, %v356_v16 }
 0x1ce   :  { %v362_v22 = vpack.c.bf16 %v355_v19, %v354_v18  ;;  %v484_v23 = vpop.f32.mrb[4].mxu1 }
 0x1cf   :  { %v348_v24 = vadd.f32 %v484_v23, %v249_v21  ;;  %v339_v25 = vpop.f32.mrb[5].mxu1 }
 0x1d0   :  { %v340_v27 = vadd.f32 %v339_v25, %v239_v9  ;;  %v485_v28 = vpop.f32.mrb[6].mxu1  ;;  %487 = vmatpush3.bf16.msra.mxu0 %v362_v22 }
 0x1d1   :  { %v351_v29 = vadd.f32 %v485_v28, %v254_v26  ;;  %v342_v30 = vpop.f32.mrb[7].mxu1  ;;  %488 = vmatprep.subr.bf16.mxu0 %v513_v1  ;;  %v360_v32 = vmax.f32 %v348_v24, 0.0 }
 0x1d2   :  { %v343_v31 = vadd.f32 %v342_v30, %v244_v14  ;;  %v358_v34 = vmax.f32 %v340_v27, 0.0 }
 0x1d3   :  { %v361_v33 = vmax.f32 %v351_v29, 0.0 }
 0x1d4   :  { %v359_v35 = vmax.f32 %v343_v31, 0.0  ;;  %489 = vmatpush3.bf16.msra.mxu0 %v363_v20 }
 0x1d5   :  { %v365_v36 = vpack.c.bf16 %v361_v33, %v360_v32  ;;  %490 = vmatprep.subr.bf16.mxu0 %v513_v1 }
 0x1d6   :  { %v364_v37 = vpack.c.bf16 %v359_v35, %v358_v34 }
 0x1d8   :  { %491 = vmatpush3.bf16.msra.mxu0 %v364_v37 }
 0x1d9   :  { %492 = vmatprep.subr.bf16.mxu0 %v513_v1 }
 0x1dc   :  { %493 = vmatpush3.bf16.msra.mxu0 %v365_v36 }
 0x1df   :  { %495 = vmatmul.mubr.msk.bf16.vlgmr.msra.gmra.mrb[8].mxu0 %vm276_vm2, %v366_v38 }
 0x2b2   :  { %v414_v44 = vpop.f32.mrb[8].mxu0 }
 0x2b3   :  { %v415_v45 = vadd.f32 %v414_v44, %v376_v43  ;;  %v496_v46 = vpop.f32.mrb[9].mxu0 }
 0x2b4   :  { %v417_v47 = vpop.f32.mrb[10].mxu0 }
 0x2b5   :  { %420 = vst [vmem:[%s655_s7] sm:$0x1] %v415_v45  ;;  %v497_v48 = vpop.f32.mrb[11].mxu0 }

</bundles_post_ra>
